<compile_context>
chip_gen: v7x
topology: tpu7x:2x2x1
jax: 0.10.0
libtpu: 0.0.40
codegen_flags: <defaults>
</compile_context>

<pallas_src>
import functools

import jax
import jax.numpy as jnp
from jax import lax
from jax.experimental import pallas as pl
from jax.experimental.pallas import tpu as pltpu


# --------------------------------------------------------------------------
# Small utilities
# --------------------------------------------------------------------------

def _pick_tile(n, max_tile):
    """Largest divisor of n that is <= max_tile (keeps grids exact)."""
    t = max(1, min(n, max_tile))
    while n % t:
        t -= 1
    return t


@functools.lru_cache(maxsize=None)
def _vmem_limit_bytes():
    """Generation-aware scoped-VMEM limit.

    v5e/v6e have 128 MiB of physical VMEM per TensorCore -> use ~96 MiB.
    v7x has 64 MiB per TensorCore -> stay under ~48 MiB.
    Falls back to a conservative 48 MiB if the query is unavailable.
    """
    try:
        cap = int(pltpu.get_tpu_info().vmem_capacity_bytes)
    except Exception:
        return 48 * 1024 * 1024
    if cap >= 100 * 1024 * 1024:          # v5e / v6e
        return 96 * 1024 * 1024
    return min(48 * 1024 * 1024, max(16 * 1024 * 1024, (cap * 3) // 4))


@functools.lru_cache(maxsize=None)
def _buffered1_ok():
    """Probe whether pipeline_mode=pl.Buffered(1) is accepted by this backend."""
    try:
        def k(x_ref, o_ref):
            o_ref[...] = x_ref[...]

        out = pl.pallas_call(
            k,
            out_shape=jax.ShapeDtypeStruct((8, 128), jnp.float32),
            grid=(1,),
            in_specs=[pl.BlockSpec((8, 128), lambda i: (0, 0),
                                   pipeline_mode=pl.Buffered(1))],
            out_specs=pl.BlockSpec((8, 128), lambda i: (0, 0)),
        )(jnp.zeros((8, 128), jnp.float32))
        jax.block_until_ready(out)
        return True
    except Exception:
        return False


def _resident_spec(block_shape, index_map):
    """BlockSpec for weight blocks whose index is constant (or changes only
    with the 'direction' grid axis): single-buffer them to free VMEM."""
    if _buffered1_ok():
        return pl.BlockSpec(block_shape, index_map, pipeline_mode=pl.Buffered(1))
    return pl.BlockSpec(block_shape, index_map)


# --------------------------------------------------------------------------
# Plain sequence linear (used for the fused key/value projection)
# --------------------------------------------------------------------------

def _seq_linear_kernel(x_ref, w_ref, b_ref, o_ref):
    """(tt, B, Din) @ (Din, Dout) + b -> (tt, B, Dout). bf16 MXU, f32 accum."""
    tt, bb, din = x_ref.shape
    dout = w_ref.shape[1]
    x = x_ref[...].reshape(tt * bb, din).astype(jnp.bfloat16)
    acc = jnp.dot(x, w_ref[...], preferred_element_type=jnp.float32)
    acc = acc + b_ref[...]
    o_ref[...] = acc.reshape(tt, bb, dout).astype(o_ref.dtype)


def seq_linear(x, w_bf16, b_f32, *, max_rows=512, out_dtype=jnp.float32):
    """x: (T, B, Din), w: (Din, Dout) bf16, b: (Dout,) f32 -> (T, B, Dout)."""
    T, B, Din = x.shape
    Dout = w_bf16.shape[1]
    tt = _pick_tile(T, max(1, max_rows // B))
    b2 = b_f32.reshape(1, Dout)
    return pl.pallas_call(
        _seq_linear_kernel,
        out_shape=jax.ShapeDtypeStruct((T, B, Dout), out_dtype),
        grid=(T // tt,),
        in_specs=[
            pl.BlockSpec((tt, B, Din), lambda i: (i, 0, 0)),
            _resident_spec((Din, Dout), lambda i: (0, 0)),
            _resident_spec((1, Dout), lambda i: (0, 0)),
        ],
        out_specs=pl.BlockSpec((tt, B, Dout), lambda i: (i, 0, 0)),
        compiler_params=pltpu.CompilerParams(
            dimension_semantics=("parallel",),
            vmem_limit_bytes=_vmem_limit_bytes(),
        ),
    )(x, w_bf16, b2)


# --------------------------------------------------------------------------
# Fused bidirectional LSTM (input projection + recurrence in one kernel)
# --------------------------------------------------------------------------

def _bilstm_kernel(x_ref, wih_ref, b_ref, whh_ref, out_ref,
                   gx_sc, h_sc, c_sc, *, hidden, chunk):
    """grid = (direction d, time-chunk c).

    x_ref:  (chunk, P, B, Din) input chunk (P=2 carries the even/odd timestep
            halves of a pBLSTM layer; P=1 for a plain layer).
    wih_ref:(P, Din, 4H) bf16 -- this direction's input-gate weights.
    b_ref:  (1, 1, 4H) f32    -- this direction's fused bias (b_ih + b_hh).
    whh_ref:(H, 4H) bf16      -- this direction's recurrent weights.
    out_ref:(chunk, B, H)     -- this direction's H-wide column block of the
            (T, B, 2H) output.
    (h, c) live in VMEM scratch indexed by direction and persist across time
    chunks; they are reset at each direction's first chunk.
    """
    d = pl.program_id(0)
    c = pl.program_id(1)

    @pl.when(c == 0)
    def _():
        zeros = jnp.zeros(h_sc.shape[1:], h_sc.dtype)
        h_sc[d] = zeros
        c_sc[d] = zeros

    tt, npair, bb, din = x_ref.shape

    # Gate input projection for the whole chunk: one (chunk*B, Din)@(Din, 4H)
    # MXU matmul per pair slot (bf16 operands, f32 accumulation).  Stored to
    # VMEM scratch so the time loop can index it dynamically.
    x = x_ref[...].astype(jnp.bfloat16)
    acc = jnp.dot(x[:, 0].reshape(tt * bb, din), wih_ref[0],
                  preferred_element_type=jnp.float32)
    for p in range(1, npair):
        acc = acc + jnp.dot(x[:, p].reshape(tt * bb, din), wih_ref[p],
                            preferred_element_type=jnp.float32)
    gx_sc[...] = (acc + b_ref[0]).reshape(tt, bb, 4 * hidden)

    whh = whh_ref[...]                       # (H, 4H) bf16, resident

    def step(s, carry):
        h, cell = carry
        # direction 0 walks the chunk forward, direction 1 backward
        t = (1 - d) * s + d * (chunk - 1 - s)
        gates = gx_sc[t] + jnp.dot(h.astype(jnp.bfloat16), whh,
                                   preferred_element_type=jnp.float32)
        i_g = jax.nn.sigmoid(gates[:, 0 * hidden:1 * hidden])
        f_g = jax.nn.sigmoid(gates[:, 1 * hidden:2 * hidden])
        g_g = jnp.tanh(gates[:, 2 * hidden:3 * hidden])
        o_g = jax.nn.sigmoid(gates[:, 3 * hidden:4 * hidden])
        cell = f_g * cell + i_g * g_g
        h = o_g * jnp.tanh(cell)
        out_ref[t] = h.astype(out_ref.dtype)
        return h, cell

    unroll = 4 if chunk % 4 == 0 else (2 if chunk % 2 == 0 else 1)
    h, cell = lax.fori_loop(0, chunk, step, (h_sc[d], c_sc[d]), unroll=unroll)
    h_sc[d] = h
    c_sc[d] = cell


def bilstm_layer(x_seq, lp, *, max_chunk=64):
    """x_seq: (T, P, B, Din) (P=1 plain / P=2 pBLSTM-paired timesteps).
    Returns (T, B, 2H) bf16 with fwd hiddens in [..., :H], bwd in [..., H:]."""
    T, P, B, Din = x_seq.shape
    wih, bias, whh = lp["wih"], lp["b"], lp["whh"]
    hidden = whh.shape[0] // 2
    G = 4 * hidden

    chunk = _pick_tile(T, max_chunk)
    nc = T // chunk

    def tb(d, c):  # direction 0 walks chunks forward, direction 1 backward
        return c * (1 - d) + (nc - 1 - c) * d

    kernel = functools.partial(_bilstm_kernel, hidden=hidden, chunk=chunk)
    cost = pl.CostEstimate(
        flops=2 * 2 * T * B * (P * Din + hidden) * G,
        transcendentals=2 * T * B * 5 * hidden,
        bytes_accessed=int(2 * x_seq.size * x_seq.dtype.itemsize
                           + T * B * 2 * hidden * 2
                           + wih.size * 2 + whh.size * 2),
    )
    return pl.pallas_call(
        kernel,
        out_shape=jax.ShapeDtypeStruct((T, B, 2 * hidden), jnp.bfloat16),
        grid=(2, nc),
        in_specs=[
            pl.BlockSpec((chunk, P, B, Din), lambda d, c: (tb(d, c), 0, 0, 0)),
            _resident_spec((P, Din, G), lambda d, c: (d, 0, 0)),
            _resident_spec((1, 1, G), lambda d, c: (d, 0, 0)),
            _resident_spec((hidden, G), lambda d, c: (d, 0)),
        ],
        out_specs=pl.BlockSpec((chunk, B, hidden),
                               lambda d, c: (tb(d, c), 0, d)),
        scratch_shapes=[
            pltpu.VMEM((chunk, B, G), jnp.float32),    # per-chunk gate inputs
            pltpu.VMEM((2, B, hidden), jnp.float32),   # per-direction h state
            pltpu.VMEM((2, B, hidden), jnp.float32),   # per-direction c state
        ],
        compiler_params=pltpu.CompilerParams(
            dimension_semantics=("parallel", "arbitrary"),
            vmem_limit_bytes=_vmem_limit_bytes(),
        ),
        cost_estimate=cost,
    )(x_seq, wih, bias, whh)


# --------------------------------------------------------------------------
# One-time parameter preparation (hoisted out of the per-utterance forward)
# --------------------------------------------------------------------------

def _prep_bilstm_layer(layer, *, paired, fold_w=None, fold_b=None):
    """Fuse one bidirectional LSTM layer into the layouts the kernel wants.

    Returns:
      wih: (2*P, Din, 4H) bf16   (P=2 for pBLSTM: even/odd timestep halves)
      b  : (2, 1, 4H) f32        per-direction fused bias (b_ih + b_hh [+fold])
      whh: (2*H, 4H) bf16        per-direction recurrent weights
    """
    wih_parts, b_parts, whh_parts = [], [], []
    for dname in ("fwd", "bwd"):
        w_ih, w_hh, b_ih, b_hh = layer[dname]
        wt = w_ih.T.astype(jnp.float32)              # (Din_total, 4H)
        bias = (b_ih + b_hh).astype(jnp.float32)
        if fold_w is not None:                       # fold linear_1 into W_ih
            bias = bias + fold_b @ wt
            wt = fold_w @ wt
        if paired:
            d2, g = wt.shape
            wt = wt.reshape(2, d2 // 2, g)           # [even-t rows, odd-t rows]
        else:
            wt = wt[None]                            # (1, Din, 4H)
        wih_parts.append(wt)
        b_parts.append(bias[None, None])             # (1, 1, 4H)
        whh_parts.append(w_hh.T)                     # (H, 4H)
    return {
        "wih": jnp.concatenate(wih_parts, axis=0).astype(jnp.bfloat16),
        "b": jnp.concatenate(b_parts, axis=0).astype(jnp.float32),
        "whh": jnp.concatenate(whh_parts, axis=0).astype(jnp.bfloat16),
    }


def prepare_encoder_params(params):
    """One-time weight re-layout (transpose / direction fusion / bf16 cast)."""
    w1, b1 = params["linear_1"]                      # (128, in_dim), (128,)
    prep = {
        # linear_1 folded into the base BiLSTM's input projection (both are
        # affine with no nonlinearity in between, so the fold is exact in f32).
        "lstm": _prep_bilstm_layer(params["lstm"], paired=False,
                                   fold_w=w1.T.astype(jnp.float32),
                                   fold_b=b1.astype(jnp.float32)),
        "pblstm1": _prep_bilstm_layer(params["pblstm1"], paired=True),
        "pblstm2": _prep_bilstm_layer(params["pblstm2"], paired=True),
        "pblstm3": _prep_bilstm_layer(params["pblstm3"], paired=True),
    }
    kw, kb = params["key_network"]
    vw, vb = params["value_network"]
    prep["kv_w"] = jnp.concatenate([kw, vw], axis=0).T.astype(jnp.bfloat16)
    prep["kv_b"] = jnp.concatenate([kb, vb]).astype(jnp.float32)
    return prep


# --------------------------------------------------------------------------
# Encoder forward
# --------------------------------------------------------------------------

def encoder_forward(x, lens, prep, *, key_size=128):
    """x: (B, T, input_dim) f32, lens: (B,) (assumed == T).
    Returns (keys, value), each (T // 8, B, key/value size), sequence-major
    like pad_packed_sequence(batch_first=False)."""
    del lens  # TODO(synk): variable-length pack/pad masking not implemented.
    B, T, _ = x.shape

    # Pad batch to a multiple of 16 sublanes (fills bf16 packing for all MXU
    # operands); padded rows never mix with real rows, sliced off at the end.
    Bp = max(16, -(-B // 16) * 16)
    if Bp != B:
        x = jnp.pad(x, ((0, Bp - B), (0, 0), (0, 0)))

    # pack_padded_sequence(batch_first=True) => sequence-major for the LSTMs.
    # Leading "pair" axis of size 1 (the base LSTM consumes single timesteps).
    h = jnp.transpose(x, (1, 0, 2))[:, None]          # (T, 1, Bp, in_dim)

    # Base bidirectional LSTM (linear_1 folded into its input projection).
    h = bilstm_layer(h, prep["lstm"])                 # (T, Bp, 512) bf16

    # Three pyramidal BiLSTM stages: time halved via a free reshape to
    # (T/2, 2, Bp, D); concat_pblstm's feature pairing is folded into the
    # in-kernel gate projection (no transposes / concats materialized).
    for name in ("pblstm1", "pblstm2", "pblstm3"):
        L, Bc, D = h.shape
        L2 = (L // 2) * 2
        h = h[:L2].reshape(L2 // 2, 2, Bc, D)
        h = bilstm_layer(h, prep[name])

    # Fused key / value projection on the (T', Bp, 2*hidden_dim) encodings.
    kv = seq_linear(h, prep["kv_w"], prep["kv_b"])    # (T', Bp, 256) f32
    keys = kv[:, :B, :key_size]
    value = kv[:, :B, key_size:]
    return keys, value


# --------------------------------------------------------------------------
# Parameter init (matches the PyTorch module's layer sizes)
# --------------------------------------------------------------------------

def _init_linear(key, in_dim, out_dim):
    k1, k2 = jax.random.split(key)
    bound = 1.0 / jnp.sqrt(in_dim)
    w = jax.random.uniform(k1, (out_dim, in_dim), jnp.float32, -bound, bound)
    b = jax.random.uniform(k2, (out_dim,), jnp.float32, -bound, bound)
    return (w, b)


def _init_bilstm(key, input_dim, hidden):
    bound = 1.0 / jnp.sqrt(hidden)
    params = {}
    for direction in ("fwd", "bwd"):
        key, k1, k2, k3, k4 = jax.random.split(key, 5)
        params[direction] = (
            jax.random.uniform(k1, (4 * hidden, input_dim), jnp.float32, -bound, bound),
            jax.random.uniform(k2, (4 * hidden, hidden), jnp.float32, -bound, bound),
            jax.random.uniform(k3, (4 * hidden,), jnp.float32, -bound, bound),
            jax.random.uniform(k4, (4 * hidden,), jnp.float32, -bound, bound),
        )
    return params


def init_encoder_params(key, input_dim, hidden_dim, value_size=128, key_size=128):
    keys = jax.random.split(key, 7)
    return {
        "linear_1": _init_linear(keys[0], input_dim, 128),
        "lstm": _init_bilstm(keys[1], 128, 256),
        "pblstm1": _init_bilstm(keys[2], 1024, 256),
        "pblstm2": _init_bilstm(keys[3], 1024, 256),
        "pblstm3": _init_bilstm(keys[4], 1024, hidden_dim),
        "key_network": _init_linear(keys[5], hidden_dim * 2, value_size),
        "value_network": _init_linear(keys[6], hidden_dim * 2, key_size),
    }


# --------------------------------------------------------------------------
# Main
# --------------------------------------------------------------------------

if __name__ == "__main__":
    B, T, INPUT_DIM, HIDDEN_DIM = 2, 16, 32, 128

    root = jax.random.PRNGKey(0)
    k_param, k_x = jax.random.split(root)
    params = init_encoder_params(k_param, INPUT_DIM, HIDDEN_DIM)

    # Warm backend-capability probes (kept out of the jitted trace).
    _ = _vmem_limit_bytes()
    _ = _buffered1_ok()

    # One-time fused / transposed / bf16 weight layouts.
    prep = jax.jit(prepare_encoder_params)(params)
    jax.block_until_ready(prep)

    x = jax.random.normal(k_x, (B, T, INPUT_DIM), dtype=jnp.float32)
    lens = jnp.full((B,), T, dtype=jnp.int32)

    encoder = jax.jit(functools.partial(encoder_forward, key_size=128))
    keys, value = encoder(x, lens, prep)
    jax.block_until_ready((keys, value))

    assert keys.shape == (T // 8, B, 128), keys.shape
    assert value.shape == (T // 8, B, 128), value.shape
    assert bool(jnp.all(jnp.isfinite(keys))) and bool(jnp.all(jnp.isfinite(value)))
    print("KERNEL_OK")
</pallas_src>

<mosaic_0001>
module attributes {stable_mosaic.version = 11 : i64} {
  func.func @k(%arg0: i32, %arg1: memref<8x128xf32, #tpu.memory_space<vmem>>, %arg2: memref<8x128xf32, #tpu.memory_space<vmem>>) attributes {dimension_semantics = [#tpu.dimension_semantics<arbitrary>], iteration_bounds = array<i64: 1>, scalar_prefetch = 0 : i64, scratch_operands = 0 : i64, tpu.core_type = #tpu.core_type<tc>, window_params = [{pipeline_mode = #tpu.pipeline_mode<synchronous>, transform_indices = @transform_0, window_bounds = array<i64: 8, 128>}, {pipeline_mode = #tpu.pipeline_mode<synchronous>, transform_indices = @transform_1, window_bounds = array<i64: 8, 128>}]} {
    %c0 = arith.constant 0 : index
    %c0_0 = arith.constant 0 : index
    %0 = vector.load %arg1[%c0, %c0_0] : memref<8x128xf32, #tpu.memory_space<vmem>>, vector<8x128xf32>
    %c0_1 = arith.constant 0 : index
    %c0_2 = arith.constant 0 : index
    %1 = vector.load %arg2[%c0_1, %c0_2] : memref<8x128xf32, #tpu.memory_space<vmem>>, vector<8x128xf32>
    tpu.vector_store %arg2[%c0_1, %c0_2], %0 {strides = array<i32>} : memref<8x128xf32, #tpu.memory_space<vmem>>, vector<8x128xf32>,
    return
  }
  func.func @transform_0(%arg0: i32) -> (i32, i32) {
    %c0_i32 = arith.constant 0 : i32
    %c0_i32_0 = arith.constant 0 : i32
    %c0_i32_1 = arith.constant 0 : i32
    return %c0_i32, %c0_i32_0 : i32, i32
  }
  func.func @transform_1(%arg0: i32) -> (i32, i32) {
    %c0_i32 = arith.constant 0 : i32
    %c0_i32_0 = arith.constant 0 : i32
    %c0_i32_1 = arith.constant 0 : i32
    return %c0_i32, %c0_i32_0 : i32, i32
  }
}

</mosaic_0001>

<bundles_post_ra>
// kernel: tpu_custom_call.1
= control target key start
LH: loop header
LB: loop body
LE: loop exit
PB: predicated region body
PF: predicated region fallthrough
CT: control target
= control target key end

     0   :  { %6 = vsyncpa [#allocation3], 0  ;;  %s124_s0 = inlined_call_operand.hbm [shape: f32[8,128], index: 0, kind: input, shape index: {}]   ;;  %s125_s1 = inlined_call_operand.hbm [shape: f32[8,128], index: 1, kind: output, shape index: {}]  }
   0x1   :  { %7 = vsyncpa [#allocation4], 0  ;;  %s88_s6 = smov [#allocation2]   ;;  %s40_s10 = scalar_lea.hbm %s124_s0, 128 }
   0x2   :  { %s14_s7 = sshll.u32 %s88_s6, 4  ;;  %p41_p0 = scmp.ne.s32.totalorder %s124_s0, %s40_s10  ;;  %s15_s7 = int_to_ptr.vmem [resolvable:$true] %s14_s7 }
   0x3   :  { %p44_p1 = scmp.lt.u32.totalorder %s40_s10, %s124_s0 }
   0x5   :  { %p46_p2 = pnand %p44_p1, %p41_p0 }
   0x7   :  { %49 = shalt.err (!%p46_p2)
}
   0x8   :  { %s50_s15 = scalar_lea.vmem %s15_s7, 128  ;;  %p55_p4 = scmp.lt.s32.totalorder %s15_s7, %s15_s7 }
   0x9   :  { %p51_p3 = scmp.ne.s32.totalorder %s15_s7, %s50_s15  ;;  %p56_p5 = scmp.lt.s32.totalorder %s50_s15, %s50_s15 }
   0xb   :  { %p57_p6 = por %p56_p5, %p55_p4 }
   0xd   :  { %p58_p7 = pnand %p57_p6, %p51_p3 }
   0xf   :  { %61 = shalt.err (!%p58_p7)
}
  0x10   :  { %17 = dma.hbm_to_vmem [thread:$0]  %s124_s0, 128, %s15_s7, [#allocation3]  }
  0x11   :  { %84 = dma.done.wait [#allocation3], 128  }
  0x12   :  { %85 = vsyncadd [#allocation3], 4294967168  ;;  %s89_s18 = smov [#allocation5]   ;;  %v21_v0 = vld [vmem:[#allocation2] sm:$0xff] }
  0x13   :  { %s29_s19 = sshll.u32 %s89_s18, 4  ;;  %22 = vst [vmem:[#allocation5] sm:$0xff] %v21_v0  ;;  %s30_s19 = int_to_ptr.vmem [resolvable:$true] %s29_s19 }
  0x14   :  { %s62_s20 = scalar_lea.vmem %s30_s19, 128  ;;  %p67_p9 = scmp.lt.s32.totalorder %s30_s19, %s30_s19 }
  0x15   :  { %p63_p8 = scmp.ne.s32.totalorder %s30_s19, %s62_s20  ;;  %p68_p10 = scmp.lt.s32.totalorder %s62_s20, %s62_s20 }
  0x17   :  { %p69_p11 = por %p68_p10, %p67_p9 }
  0x19   :  { %p70_p12 = pnand %p69_p11, %p63_p8 }
  0x1b   :  { %73 = shalt.err (!%p70_p12)
}
  0x1c   :  { %s74_s23 = scalar_lea.hbm %s125_s1, 128 }
  0x1d   :  { %p75_p13 = scmp.ne.s32.totalorder %s125_s1, %s74_s23  ;;  %p78_p0 = scmp.lt.u32.totalorder %s74_s23, %s125_s1 }
  0x1f   :  { %p80_p1 = pnand %p78_p0, %p75_p13 }
  0x21   :  { %83 = shalt.err (!%p80_p1)
}
  0x22   :  { %32 = dma.vmem_to_hbm [thread:$0]  %s30_s19, 128, %s125_s1, [#allocation4]  }
  0x23   :  { %86 = dma.done.wait [#allocation4], 128  }
  0x24   :  { %87 = vsyncadd [#allocation4], 4294967168 }
  0x25   :  { %36 = vsyncpa [#allocation3], 1 }
  0x26   :  { %37 = vsyncpa [#allocation4], 1 }

</bundles_post_ra>
